<compile_context>
chip_gen: v7x
topology: tpu7x:2x2x1
jax: 0.10.0
libtpu: 0.0.40
codegen_flags: <defaults>
</compile_context>

<pallas_src>
import functools

import jax
import jax.numpy as jnp
from jax.experimental import pallas as pl
from jax.experimental.pallas import tpu as pltpu


# --------------------------------------------------------------------------- #
# Helpers
# --------------------------------------------------------------------------- #
def _vmem_capacity_bytes():
    """Physical VMEM per TensorCore (128 MiB v5e/v6e, 64 MiB v7x); safe fallback."""
    try:
        cap = getattr(pltpu.get_tpu_info(), "vmem_capacity_bytes", None)
        if cap:
            return int(cap)
    except Exception:
        pass
    return 64 * 1024 * 1024  # conservative (v7x per-TC)


def _round_up(x, m):
    return ((x + m - 1) // m) * m


def _divisor_leq(n, cap, mult=1):
    """Largest divisor of n that is <= cap and (a multiple of `mult` or == n).

    Falls back to n itself if no such divisor exists (always correct; may exceed
    the requested cap for awkward extents)."""
    n = int(n)
    cap = int(max(1, min(cap, n)))
    for d in range(cap, 0, -1):
        if n % d == 0 and (d % mult == 0 or d == n):
            return d
    return n


def _compiler_params(grid_rank, vmem_cap):
    return pltpu.CompilerParams(
        dimension_semantics=("parallel",) * grid_rank,
        vmem_limit_bytes=int(vmem_cap * 3 // 4),
    )


def _cost(n_elem, n_rows, itemsize):
    # Purely advisory: the kernel is HBM-bandwidth bound.
    return pl.CostEstimate(
        flops=int(10 * n_elem),
        transcendentals=int(n_rows),
        bytes_accessed=int(2 * n_elem * itemsize),
    )


# --------------------------------------------------------------------------- #
# Kernels
# --------------------------------------------------------------------------- #
def _ln_lastdim_kernel(x_ref, w_ref, b_ref, o_ref, *, eps):
    # Normalize over the last (lane) axis. x block: (..., C); w/b: (1, C).
    x = x_ref[...].astype(jnp.float32)
    mean = jnp.mean(x, axis=-1, keepdims=True)
    xc = x - mean
    var = jnp.mean(xc * xc, axis=-1, keepdims=True)  # biased variance (matches torch)
    inv = jax.lax.rsqrt(var + eps)
    o_ref[...] = (xc * inv * w_ref[...] + b_ref[...]).astype(o_ref.dtype)


def _ln_chanfirst_kernel(x_ref, w_ref, b_ref, o_ref, *, eps):
    # Normalize over axis 1 (channel planes). x block: (blkB, C, blkH, W); w/b: (C,1,1).
    # Reducing a non-minor axis is elementwise adds across planes (VPU only).
    x = x_ref[...].astype(jnp.float32)
    mean = jnp.mean(x, axis=1, keepdims=True)
    xc = x - mean
    var = jnp.mean(xc * xc, axis=1, keepdims=True)   # biased variance (matches torch)
    inv = jax.lax.rsqrt(var + eps)
    o_ref[...] = (xc * inv * w_ref[...] + b_ref[...]).astype(o_ref.dtype)


# --------------------------------------------------------------------------- #
# Wrappers
# --------------------------------------------------------------------------- #
def _layer_norm_channels_last_4d(x, weight, bias, eps):
    B, H, W, C = x.shape
    cap = _vmem_capacity_bytes()
    budget = max(1 << 20, cap // 8)            # per-grid-step block budget
    itemsize = max(x.dtype.itemsize, 4)        # kernel computes in f32
    bytes_per_h = W * C * itemsize * 4         # in + out, double buffered
    bytes_per_b = H * bytes_per_h

    # Prefer whole images per block; keep >= ~8 grid steps for pipelining and
    # megacore sharding, and split along H only if one image exceeds the budget.
    blk_b = _divisor_leq(B, min(max(1, budget // max(bytes_per_b, 1)),
                                max(1, B // min(B, 8))))
    blk_h = H
    if blk_b == 1 and bytes_per_b > budget:
        blk_h = _divisor_leq(H, max(1, budget // max(bytes_per_h, 1)))
    if B // blk_b == 1 and H // blk_h == 1 and H > 1:
        blk_h = _divisor_leq(H, max(1, H // 2))      # keep >= 2 steps for v7x's 2 TCs

    w = weight.astype(jnp.float32).reshape(1, C)
    b = bias.astype(jnp.float32).reshape(1, C)
    grid = (B // blk_b, H // blk_h)
    return pl.pallas_call(
        functools.partial(_ln_lastdim_kernel, eps=float(eps)),
        out_shape=jax.ShapeDtypeStruct((B, H, W, C), x.dtype),
        grid_spec=pltpu.PrefetchScalarGridSpec(
            num_scalar_prefetch=0,
            grid=grid,
            in_specs=[
                pl.BlockSpec((blk_b, blk_h, W, C), lambda i, j: (i, j, 0, 0)),
                pl.BlockSpec((1, C), lambda i, j: (0, 0)),
                pl.BlockSpec((1, C), lambda i, j: (0, 0)),
            ],
            out_specs=pl.BlockSpec((blk_b, blk_h, W, C), lambda i, j: (i, j, 0, 0)),
        ),
        compiler_params=_compiler_params(2, cap),
        cost_estimate=_cost(B * H * W * C, B * H * W, x.dtype.itemsize),
    )(x, w, b)


def _layer_norm_channels_first(x, weight, bias, eps):
    B, C, H, W = x.shape
    cap = _vmem_capacity_bytes()
    budget = max(1 << 20, cap // 8)
    itemsize = max(x.dtype.itemsize, 4)
    bytes_per_h = C * W * itemsize * 4
    bytes_per_b = H * bytes_per_h

    blk_b = _divisor_leq(B, min(max(1, budget // max(bytes_per_b, 1)),
                                max(1, B // min(B, 8))))
    blk_h = H
    if blk_b == 1 and bytes_per_b > budget:
        # blk_h is the block's second-minor dim -> multiple of 8 (or full H).
        blk_h = _divisor_leq(H, max(1, budget // max(bytes_per_h, 1)), mult=8)
    if B // blk_b == 1 and H // blk_h == 1 and H > 1:
        blk_h = _divisor_leq(H, max(1, H // 2), mult=8)

    w = weight.astype(jnp.float32).reshape(C, 1, 1)
    b = bias.astype(jnp.float32).reshape(C, 1, 1)
    grid = (B // blk_b, H // blk_h)
    return pl.pallas_call(
        functools.partial(_ln_chanfirst_kernel, eps=float(eps)),
        out_shape=jax.ShapeDtypeStruct((B, C, H, W), x.dtype),
        grid_spec=pltpu.PrefetchScalarGridSpec(
            num_scalar_prefetch=0,
            grid=grid,
            in_specs=[
                pl.BlockSpec((blk_b, C, blk_h, W), lambda i, j: (i, 0, j, 0)),
                pl.BlockSpec((C, 1, 1), lambda i, j: (0, 0, 0)),
                pl.BlockSpec((C, 1, 1), lambda i, j: (0, 0, 0)),
            ],
            out_specs=pl.BlockSpec((blk_b, C, blk_h, W), lambda i, j: (i, 0, j, 0)),
        ),
        compiler_params=_compiler_params(2, cap),
        cost_estimate=_cost(B * C * H * W, B * H * W, x.dtype.itemsize),
    )(x, w, b)


def _layer_norm_rows_2d(x2d, weight, bias, eps):
    """Generic (rows, C) path with VMEM-budgeted blocks and a padded row tail."""
    rows, C = x2d.shape
    cap = _vmem_capacity_bytes()
    budget = max(1 << 20, cap // 8)
    itemsize = max(x2d.dtype.itemsize, 4)
    blk = (budget // max(C * itemsize * 4, 1)) // 8 * 8
    blk = int(max(8, min(blk, 4096)))
    if blk >= rows:
        # Split in two when there is enough work so a 2-TC chip gets >= 2 steps.
        blk = _round_up((rows + 1) // 2, 8) if rows > 16 else _round_up(max(rows, 1), 8)
    padded = _round_up(rows, blk)
    xp = jnp.pad(x2d, ((0, padded - rows), (0, 0))) if padded != rows else x2d
    w = weight.astype(jnp.float32).reshape(1, C)
    b = bias.astype(jnp.float32).reshape(1, C)
    y = pl.pallas_call(
        functools.partial(_ln_lastdim_kernel, eps=float(eps)),
        out_shape=jax.ShapeDtypeStruct((padded, C), x2d.dtype),
        grid_spec=pltpu.PrefetchScalarGridSpec(
            num_scalar_prefetch=0,
            grid=(padded // blk,),
            in_specs=[
                pl.BlockSpec((blk, C), lambda i: (i, 0)),
                pl.BlockSpec((1, C), lambda i: (0, 0)),
                pl.BlockSpec((1, C), lambda i: (0, 0)),
            ],
            out_specs=pl.BlockSpec((blk, C), lambda i: (i, 0)),
        ),
        compiler_params=_compiler_params(1, cap),
        cost_estimate=_cost(padded * C, padded, x2d.dtype.itemsize),
    )(xp, w, b)
    return y[:rows] if padded != rows else y


def layer_norm(x, weight, bias, eps=1e-6, data_format="channels_last"):
    """Pallas equivalent of the ConvNeXt LayerNorm forward pass."""
    if data_format == "channels_last":
        if x.ndim == 4:
            return _layer_norm_channels_last_4d(x, weight, bias, eps)
        # Generic (..., C): flatten leading dims into rows; tail handled by padding.
        lead, C = x.shape[:-1], x.shape[-1]
        y = _layer_norm_rows_2d(x.reshape(-1, C), weight, bias, eps)
        return y.reshape(*lead, C)
    elif data_format == "channels_first":
        if x.ndim != 4:
            raise NotImplementedError("channels_first expects (B, C, H, W)")
        return _layer_norm_channels_first(x, weight, bias, eps)
    else:
        raise NotImplementedError


# ---- pure-JAX reference (mirrors the PyTorch forward) ----------------------
def _ref_layer_norm(x, weight, bias, eps, data_format):
    if data_format == "channels_last":
        u = jnp.mean(x, axis=-1, keepdims=True)
        s = jnp.mean((x - u) ** 2, axis=-1, keepdims=True)
        return (x - u) / jnp.sqrt(s + eps) * weight + bias
    else:
        u = jnp.mean(x, axis=1, keepdims=True)
        s = jnp.mean((x - u) ** 2, axis=1, keepdims=True)
        xn = (x - u) / jnp.sqrt(s + eps)
        return weight[None, :, None, None] * xn + bias[None, :, None, None]


if __name__ == "__main__":
    key = jax.random.PRNGKey(0)
    k1, k2, k3, kw1, kb1, kw2, kb2 = jax.random.split(key, 7)
    eps = 1e-6

    # channels_last, 4-D: (B, H, W, C)
    B, H, W, C = 2, 8, 8, 32
    w_last = jnp.ones((C,), jnp.float32) + 0.1 * jax.random.normal(kw1, (C,), jnp.float32)
    b_last = jnp.zeros((C,), jnp.float32) + 0.1 * jax.random.normal(kb1, (C,), jnp.float32)
    x_last = jax.random.normal(k1, (B, H, W, C), jnp.float32)
    y = jax.block_until_ready(layer_norm(x_last, w_last, b_last, eps, "channels_last"))
    ref = _ref_layer_norm(x_last, w_last, b_last, eps, "channels_last")
    assert jnp.allclose(y, ref, rtol=1e-5, atol=1e-5), "channels_last 4-D mismatch"

    # channels_last, generic-rank fallback with a ragged row count (exercises tail padding)
    x_seq = jax.random.normal(k2, (2, 13, C), jnp.float32)
    y = jax.block_until_ready(layer_norm(x_seq, w_last, b_last, eps, "channels_last"))
    ref = _ref_layer_norm(x_seq, w_last, b_last, eps, "channels_last")
    assert jnp.allclose(y, ref, rtol=1e-5, atol=1e-5), "channels_last generic-rank mismatch"

    # channels_first: (B, C, H, W) -- native kernel, no wrapper transposes
    Bf, Cf, Hf, Wf = 2, 4, 16, 16
    w_first = jnp.ones((Cf,), jnp.float32) + 0.1 * jax.random.normal(kw2, (Cf,), jnp.float32)
    b_first = jnp.zeros((Cf,), jnp.float32) + 0.1 * jax.random.normal(kb2, (Cf,), jnp.float32)
    x_first = jax.random.normal(k3, (Bf, Cf, Hf, Wf), jnp.float32)
    y = jax.block_until_ready(layer_norm(x_first, w_first, b_first, eps, "channels_first"))
    ref = _ref_layer_norm(x_first, w_first, b_first, eps, "channels_first")
    assert jnp.allclose(y, ref, rtol=1e-5, atol=1e-5), "channels_first mismatch"

    print("KERNEL_OK")
</pallas_src>

<mosaic_0001>
module attributes {stable_mosaic.version = 11 : i64} {
  func.func @_ln_lastdim_kernel(%arg0: i32, %arg1: i32, %arg2: memref<1x8x8x32xf32, #tpu.memory_space<vmem>>, %arg3: memref<1x32xf32, #tpu.memory_space<vmem>>, %arg4: memref<1x32xf32, #tpu.memory_space<vmem>>, %arg5: memref<1x8x8x32xf32, #tpu.memory_space<vmem>>) attributes {dimension_semantics = [#tpu.dimension_semantics<parallel>, #tpu.dimension_semantics<parallel>], iteration_bounds = array<i64: 2, 1>, scalar_prefetch = 0 : i64, scratch_operands = 0 : i64, tpu.core_type = #tpu.core_type<tc>, window_params = [{transform_indices = @transform_0, window_bounds = array<i64: 1, 8, 8, 32>}, {pipeline_mode = #tpu.pipeline_mode<synchronous>, transform_indices = @transform_1, window_bounds = array<i64: 1, 32>}, {pipeline_mode = #tpu.pipeline_mode<synchronous>, transform_indices = @transform_2, window_bounds = array<i64: 1, 32>}, {transform_indices = @transform_3, window_bounds = array<i64: 1, 8, 8, 32>}]} {
    %c0 = arith.constant 0 : index
    %c0_0 = arith.constant 0 : index
    %c0_1 = arith.constant 0 : index
    %c0_2 = arith.constant 0 : index
    %0 = vector.load %arg2[%c0, %c0_0, %c0_1, %c0_2] : memref<1x8x8x32xf32, #tpu.memory_space<vmem>>, vector<1x8x8x32xf32>
    %cst = arith.constant dense<0.000000e+00> : vector<1x8x8xf32>
    %1 = vector.multi_reduction <add>, %0, %cst [3] : vector<1x8x8x32xf32> to vector<1x8x8xf32>
    %2 = vector.shape_cast %1 : vector<1x8x8xf32> to vector<1x8x8x1xf32>
    %cst_3 = arith.constant 3.200000e+01 : f32
    %3 = vector.broadcast %cst_3 : f32 to vector<1x8x8x1xf32>
    %4 = arith.divf %2, %3 : vector<1x8x8x1xf32>
    %5 = vector.broadcast %4 : vector<1x8x8x1xf32> to vector<1x8x8x32xf32>
    %6 = arith.subf %0, %5 : vector<1x8x8x32xf32>
    %7 = arith.mulf %6, %6 : vector<1x8x8x32xf32>
    %cst_4 = arith.constant dense<0.000000e+00> : vector<1x8x8xf32>
    %8 = vector.multi_reduction <add>, %7, %cst_4 [3] : vector<1x8x8x32xf32> to vector<1x8x8xf32>
    %9 = vector.shape_cast %8 : vector<1x8x8xf32> to vector<1x8x8x1xf32>
    %cst_5 = arith.constant 3.200000e+01 : f32
    %10 = vector.broadcast %cst_5 : f32 to vector<1x8x8x1xf32>
    %11 = arith.divf %9, %10 : vector<1x8x8x1xf32>
    %cst_6 = arith.constant 9.99999997E-7 : f32
    %12 = vector.broadcast %cst_6 : f32 to vector<1x8x8x1xf32>
    %13 = arith.addf %11, %12 : vector<1x8x8x1xf32>
    %14 = math.rsqrt %13 : vector<1x8x8x1xf32>
    %15 = vector.broadcast %14 : vector<1x8x8x1xf32> to vector<1x8x8x32xf32>
    %16 = arith.mulf %6, %15 : vector<1x8x8x32xf32>
    %c0_7 = arith.constant 0 : index
    %c0_8 = arith.constant 0 : index
    %17 = vector.load %arg3[%c0_7, %c0_8] : memref<1x32xf32, #tpu.memory_space<vmem>>, vector<1x32xf32>
    %18 = vector.shape_cast %17 : vector<1x32xf32> to vector<1x1x1x32xf32>
    %19 = vector.broadcast %18 : vector<1x1x1x32xf32> to vector<1x8x8x32xf32>
    %20 = arith.mulf %16, %19 : vector<1x8x8x32xf32>
    %c0_9 = arith.constant 0 : index
    %c0_10 = arith.constant 0 : index
    %21 = vector.load %arg4[%c0_9, %c0_10] : memref<1x32xf32, #tpu.memory_space<vmem>>, vector<1x32xf32>
    %22 = vector.shape_cast %21 : vector<1x32xf32> to vector<1x1x1x32xf32>
    %23 = vector.broadcast %22 : vector<1x1x1x32xf32> to vector<1x8x8x32xf32>
    %24 = arith.addf %20, %23 : vector<1x8x8x32xf32>
    %c0_11 = arith.constant 0 : index
    %c0_12 = arith.constant 0 : index
    %c0_13 = arith.constant 0 : index
    %c0_14 = arith.constant 0 : index
    %25 = vector.load %arg5[%c0_11, %c0_12, %c0_13, %c0_14] : memref<1x8x8x32xf32, #tpu.memory_space<vmem>>, vector<1x8x8x32xf32>
    tpu.vector_store %arg5[%c0_11, %c0_12, %c0_13, %c0_14], %24 {strides = array<i32>} : memref<1x8x8x32xf32, #tpu.memory_space<vmem>>, vector<1x8x8x32xf32>,
    return
  }
  func.func @transform_0(%arg0: i32, %arg1: i32) -> (i32, i32, i32, i32) {
    %c0_i32 = arith.constant 0 : i32
    %c0_i32_0 = arith.constant 0 : i32
    %c0_i32_1 = arith.constant 0 : i32
    return %arg0, %arg1, %c0_i32, %c0_i32_0 : i32, i32, i32, i32
  }
  func.func @transform_1(%arg0: i32, %arg1: i32) -> (i32, i32) {
    %c0_i32 = arith.constant 0 : i32
    %c0_i32_0 = arith.constant 0 : i32
    %c0_i32_1 = arith.constant 0 : i32
    return %c0_i32, %c0_i32_0 : i32, i32
  }
  func.func @transform_2(%arg0: i32, %arg1: i32) -> (i32, i32) {
    %c0_i32 = arith.constant 0 : i32
    %c0_i32_0 = arith.constant 0 : i32
    %c0_i32_1 = arith.constant 0 : i32
    return %c0_i32, %c0_i32_0 : i32, i32
  }
  func.func @transform_3(%arg0: i32, %arg1: i32) -> (i32, i32, i32, i32) {
    %c0_i32 = arith.constant 0 : i32
    %c0_i32_0 = arith.constant 0 : i32
    %c0_i32_1 = arith.constant 0 : i32
    return %arg0, %arg1, %c0_i32, %c0_i32_0 : i32, i32, i32, i32
  }
}

</mosaic_0001>

<bundles_post_ra>
// kernel: tpu_custom_call.1
= control target key start
LH: loop header
LB: loop body
LE: loop exit
PB: predicated region body
PF: predicated region fallthrough
CT: control target
= control target key end

     0   :  { %8 = vsyncpa [#allocation3], 0  ;;  %s965_s0 = inlined_call_operand.hbm [shape: f32[2,8,8,32], index: 0, kind: input, shape index: {}]   ;;  %s966_s1 = inlined_call_operand.vmem [shape: f32[1,32], index: 1, kind: input, shape index: {}]   ;;  %s967_s2 = inlined_call_operand.vmem [shape: f32[1,32], index: 2, kind: input, shape index: {}]   ;;  %s968_s3 = inlined_call_operand.hbm [shape: f32[2,8,8,32], index: 3, kind: output, shape index: {}]  }
   0x1   :  { %10 = vsyncpa [#allocation3 + $0x1], 0 }
   0x2   :  { %11 = vsyncpa [#allocation4], 0 }
   0x3   :  { %13 = vsyncpa [#allocation4 + $0x1], 0  ;;  %s705_s12 = smov 0   ;;  %s707_s13 = smov 0  }
   0x4   :  { %s709_s14 = smov 0   ;;  %s711_s15 = smov 0  }
   0x5   :  { %s713_s16 = smov 0   ;;  %s715_s17 = smov 0  }
   0x6 LB: > { %s464_s18 = sadd.s32 4294967295, %s677_s17   ;;  %s465_s19 = sadd.s32 4294967294, %s677_s17   ;;  %s677_s17 = sphi %s715_s17, %s19_s17   ;;  %s673_s16 = sphi %s713_s16, %s983_s16   ;;  %s669_s15 = sphi %s711_s15, %s982_s15   ;;  %s665_s14 = sphi %s709_s14, %s981_s14   ;;  %s661_s13 = sphi %s707_s13, %s980_s13   ;;  %s657_s12 = sphi %s705_s12, %s979_s12  }
   0x7   : > { %s31_s20 = sadd.s32 1, %s673_s16  ;;  %s40_s21 = sadd.s32 1, %s665_s14 }
   0x8   : > { %p33_p0 = scmp.ge.s32.totalorder %s31_s20, 2  ;;  %p47_p1 = scmp.ne.s32.totalorder %s665_s14, %s661_s13 }
   0x9   : > { %p48_p2 = scmp.eq.s32.totalorder %s677_s17, 0  ;;  %p53_p3 = scmp.ne.s32.totalorder %s661_s13, %s657_s12 }
   0xa   : > { %s985_s20 = smov (%p33_p0, %s31_s20), 0  ;;  %p54_p5 = scmp.eq.s32.totalorder %s464_s18, 0 }
   0xb   : > { %p746_p4 = por %p48_p2, %p47_p1  ;;  %s35_s23 = ssub.s32 %s673_s16, %s985_s20 }
   0xc   : > { %p121_p6 = scmp.eq.s32.totalorder %s464_s18, 1  ;;  %p38_p7 = scmp.eq.s32.totalorder %s35_s23, 0 }
   0xd   : > { %p752_p8 = por %p54_p5, %p53_p3  ;;  %p127_p10 = scmp.eq.s32.totalorder %s465_s19, 1 }
   0xe   : > { %p756_p9 = por %p121_p6, %p47_p1  ;;  %p495_p13 = scmp.lt.s32.totalorder %s677_s17, 2 }
   0xf   : > { %s761_s26 = scalar_select %p38_p7, %s665_s14, %s40_s21  }
  0x10   : > { %s972_s25 = scalar_select %p756_p9, 1, 0 }
  0x11   : > { %p763_p11 = por %p127_p10, %p53_p3  ;;  %s153_s28 = sand.u32 1, %s665_s14  }
  0x12   : > { %s468_s29 = sshll.u32 %s153_s28, 6  ;;  %s481_s30 = sshll.u32 %s673_s16, 10 }
  0x13   : > { %s973_s27 = scalar_select %p763_p11, 1, 0 }
  0x14   : > { %s774_s6 = scalar_lea.hbm %s965_s0, %s481_s30  ;;  %s157_s7 = scalar_lea.vmem [#allocation2], %s468_s29 }
  0x15   : > { %s166_s8 = sshll.u32 %s157_s7, 4  ;;  %p780_p0 = pnand %p495_p13, %p746_p4  ;;  %s776_s8 = int_to_ptr.vmem [resolvable:$true] %s166_s8 }
  0x16   : > { %s785_s10 = scalar_lea.sflag [#allocation3], %s153_s28  ;;  %s565_s11 = scalar_lea.hbm %s774_s6, 1024 }
  0x17   : > { %p566_p2 = scmp.ne.s32.totalorder %s774_s6, %s565_s11  ;;  %p567_p3 = pneg %p780_p0 }
  0x18   : > { %s570_s21 = scalar_lea.hbm %s965_s0, 2048  ;;  %p571_p4 = scmp.lt.u32.totalorder %s774_s6, %s965_s0 }
  0x19   : > { %p568_p5 = pnand %p567_p3, %p566_p2  ;;  %p572_p7 = scmp.lt.u32.totalorder %s570_s21, %s565_s11 }
  0x1a   : > { %p574_p13 = scmp.lt.u32.totalorder %s565_s11, %s774_s6 }
  0x1b   : > { %p569_p6 = pneg %p568_p5  ;;  %p573_p10 = por %p572_p7, %p571_p4 }
  0x1d   : > { %p575_p12 = por %p574_p13, %p573_p10 }
  0x1f   : > { %p576_p1 = pnand %p575_p12, %p569_p6 }
  0x21   : > { %579 = shalt.err (!%p576_p1)
}
  0x22   : > { %s580_s28 = scalar_lea.vmem %s776_s8, 1024  ;;  %s679_s29 = smov [#allocation2]  }
  0x23   : > { %p581_p2 = scmp.ne.s32.totalorder %s776_s8, %s580_s28  ;;  %s585_s30 = sshll.u32 %s679_s29, 4  ;;  %s586_s30 = int_to_ptr.vmem [resolvable:$false] %s585_s30 }
  0x24   : > { %s587_s4 = scalar_lea.vmem %s586_s30, 2048  ;;  %p588_p9 = scmp.lt.s32.totalorder %s776_s8, %s586_s30 }
  0x25   : > { %p583_p5 = pnand %p581_p2, %p567_p3  ;;  %p589_p4 = scmp.lt.s32.totalorder %s587_s4, %s580_s28 }
  0x27   : > { %p584_p11 = pneg %p583_p5  ;;  %p590_p7 = por %p589_p4, %p588_p9 }
  0x29   : > { %p591_p10 = pnand %p590_p7, %p584_p11 }
  0x2b   : > { %594 = shalt.err (!%p591_p10)
}
  0x2c   : > { %s680_s5 = smov 128   ;;  %s681_s7 = smov 8  }
  0x2d   : > { %490 = dma.hbm_to_vmem [thread:$0]  (!%p780_p0), %s774_s6, 1024, %s776_s8, %s785_s10, %s680_s5, %s680_s5, %s681_s7  }
  0x2e   : > { %p174_p12 = scmp.lt.s32.totalorder %s677_s17, 3  ;;  %p975_p1 = scmp.ge.s32.totalorder %s677_s17, 1 }
  0x30   : > { %p175_p3 = pnand %p975_p1, %p174_p12 }
  0x31   : > { %s817_s11 = sand.u32 (!%p175_p3), 1, %s661_s13  }
  0x32   : > { %178 = sbr.rel (%p175_p3) target bundleno = 403 (0x193), region = 32  ;;  %s472_s18 = sshll.u32 (!%p175_p3), %s817_s11, 6 }
  0x33   : > { %s181_s19 = scalar_lea.sflag (!%p175_p3), [#allocation3], %s817_s11  ;;  %s184_s21 = scalar_lea.vmem (!%p175_p3), [#allocation2], %s472_s18 }
  0x39   : > { %648 = dma.done.wait (%p752_p8), %s181_s19, 1024  }
  0x3a   : > { %650 = vsyncadd (%p752_p8), %s181_s19, 4294966272  ;;  %vm217_vm0 = vcmask 261120   ;;  %v209_v0 = vld [vmem:[%s184_s21] sm:$0xff]  ;;  %v211_v1 = vld [vmem:[%s184_s21 + $0x10] sm:$0xff]  ;;  %s886_s10 = scalar_lea.vmem [#allocation5], %s472_s18  ;;  %s482_s22 = sshll.u32 %s669_s15, 10 }
  0x3b   : > { %v210_v2 = vld [vmem:[%s184_s21 + $0x8] sm:$0xff]  ;;  %v218_v3 = vsel %vm217_vm0, %v209_v0, 0.0  ;;  %v224_v4 = vsel %vm217_vm0, %v211_v1, 0.0  ;;  %v212_v5 = vld [vmem:[%s184_s21 + $0x18] sm:$0xff]  ;;  %v213_v8 = vld [vmem:[%s184_s21 + $0x20] sm:$0xff]  ;;  %s377_s23 = sshll.u32 %s886_s10, 4  ;;  %s912_s30 = scalar_lea.hbm %s968_s3, %s482_s22  ;;  %s914_s23 = int_to_ptr.vmem [resolvable:$true] %s377_s23 }
  0x3c   : > { %219 = vadd.xlane.f32.xlu0 %v218_v3  ;;  %225 = vadd.xlane.f32.xlu1 %v224_v4  ;;  %v221_v6 = vsel %vm217_vm0, %v210_v2, 0.0  ;;  %v227_v7 = vsel %vm217_vm0, %v212_v5, 0.0  ;;  %v214_v9 = vld [vmem:[%s184_s21 + $0x28] sm:$0xff]  ;;  %v230_v10 = vsel %vm217_vm0, %v213_v8, 0.0  ;;  %v215_v12 = vld [vmem:[%s184_s21 + $0x30] sm:$0xff]  ;;  %v216_v13 = vld [vmem:[%s184_s21 + $0x38] sm:$0xff] }
  0x3d   : > { %v233_v11 = vsel %vm217_vm0, %v214_v9, 0.0  ;;  %v236_v14 = vsel %vm217_vm0, %v215_v12, 0.0  ;;  %v239_v15 = vsel %vm217_vm0, %v216_v13, 0.0  ;;  %s362_s15 = scalar_lea.sflag [#allocation4], %s817_s11  ;;  %s595_s4 = scalar_lea.vmem %s914_s23, 1024 }
  0x3e   : > { %p596_p8 = scmp.ne.s32.totalorder %s914_s23, %s595_s4  ;;  %p976_p9 = scmp.ne.s32.totalorder %s972_s25, 0 }
  0x3f   : > { %s682_s5 = smov [#allocation5]  }
  0x40   : > { %222 = vadd.xlane.f32.xlu0 %v221_v6  ;;  %228 = vadd.xlane.f32.xlu1 %v227_v7  ;;  %p597_p11 = pnand %p596_p8, %p976_p9  ;;  %s599_s7 = sshll.u32 %s682_s5, 4  ;;  %s600_s7 = int_to_ptr.vmem [resolvable:$false] %s599_s7 }
  0x41   : > { %s601_s18 = scalar_lea.vmem %s600_s7, 2048  ;;  %p602_p6 = scmp.lt.s32.totalorder %s914_s23, %s600_s7 }
  0x42   : > { %p598_p0 = pneg %p597_p11  ;;  %p603_p13 = scmp.lt.s32.totalorder %s601_s18, %s595_s4 }
  0x44   : > { %231 = vadd.xlane.f32.xlu0 %v230_v10  ;;  %234 = vadd.xlane.f32.xlu1 %v233_v11  ;;  %p604_p2 = por %p603_p13, %p602_p6 }
  0x46   : > { %p605_p5 = pnand %p604_p2, %p598_p0 }
  0x48   : > { %237 = vadd.xlane.f32.xlu0 %v236_v14  ;;  %240 = vadd.xlane.f32.xlu1 %v239_v15 }
  0xc9   : > { %v220_v16 = vpop.xlane.xlu0 %219  ;;  %v226_v17 = vpop.xlane.xlu1 %225 }
  0xca   : > { %v243_v18 = vmul.f32 0.03125, %v220_v16  ;;  %v245_v19 = vmul.f32 0.03125, %v226_v17  ;;  %v475_v17 = vld [vmem:[%s967_s2] ss:$0 sm:$0xff] }
  0xcc   : > { %v835_v20 = vsub.f32 %v209_v0, %v243_v18  ;;  %v837_v21 = vsub.f32 %v211_v1, %v245_v19 }
  0xcd   : > { %v223_v22 = vpop.xlane.xlu0 %222  ;;  %v229_v23 = vpop.xlane.xlu1 %228 }
  0xce   : > { %v244_v24 = vmul.f32 0.03125, %v223_v22  ;;  %v246_v25 = vmul.f32 0.03125, %v229_v23  ;;  %v259_v26 = vmul.f32 %v835_v20, %v835_v20  ;;  %v261_v27 = vmul.f32 %v837_v21, %v837_v21 }
  0xd0   : > { %v843_v28 = vsub.f32 %v210_v2, %v244_v24  ;;  %v845_v29 = vsub.f32 %v212_v5, %v246_v25  ;;  %v267_v30 = vsel %vm217_vm0, %v259_v26, 0.0  ;;  %v273_v33 = vsel %vm217_vm0, %v261_v27, 0.0 }
  0xd1   : > { %268 = vadd.xlane.f32.xlu0 %v267_v30  ;;  %v232_v31 = vpop.xlane.xlu0 %231  ;;  %v235_v32 = vpop.xlane.xlu1 %234 }
  0xd2   : > { %v247_v34 = vmul.f32 0.03125, %v232_v31  ;;  %v248_v35 = vmul.f32 0.03125, %v235_v32  ;;  %v260_v36 = vmul.f32 %v843_v28, %v843_v28  ;;  %v262_v37 = vmul.f32 %v845_v29, %v845_v29 }
  0xd4   : > { %v853_v38 = vsub.f32 %v213_v8, %v247_v34  ;;  %v855_v39 = vsub.f32 %v214_v9, %v248_v35  ;;  %v270_v40 = vsel %vm217_vm0, %v260_v36, 0.0  ;;  %v276_v43 = vsel %vm217_vm0, %v262_v37, 0.0 }
  0xd5   : > { %274 = vadd.xlane.f32.xlu0 %v273_v33  ;;  %271 = vadd.xlane.f32.xlu1 %v270_v40  ;;  %v238_v41 = vpop.xlane.xlu0 %237  ;;  %v241_v42 = vpop.xlane.xlu1 %240 }
  0xd6   : > { %v249_v44 = vmul.f32 0.03125, %v238_v41  ;;  %v250_v45 = vmul.f32 0.03125, %v241_v42  ;;  %v263_v46 = vmul.f32 %v853_v38, %v853_v38  ;;  %v264_v47 = vmul.f32 %v855_v39, %v855_v39 }
  0xd8   : > { %v863_v48 = vsub.f32 %v215_v12, %v249_v44  ;;  %v865_v49 = vsub.f32 %v216_v13, %v250_v45  ;;  %v279_v50 = vsel %vm217_vm0, %v263_v46, 0.0  ;;  %v282_v51 = vsel %vm217_vm0, %v264_v47, 0.0  ;;  %v474_v12 = vld [vmem:[%s966_s1] ss:$0 sm:$0xff] }
  0xd9   : > { %277 = vadd.xlane.f32.xlu1 %v276_v43  ;;  %280 = vadd.xlane.f32.xlu0 %v279_v50 }
  0xda   : > { %v265_v52 = vmul.f32 %v863_v48, %v863_v48  ;;  %v266_v53 = vmul.f32 %v865_v49, %v865_v49 }
  0xdc   : > { %v285_v54 = vsel %vm217_vm0, %v265_v52, 0.0  ;;  %v288_v55 = vsel %vm217_vm0, %v266_v53, 0.0 }
  0xdd   : > { %283 = vadd.xlane.f32.xlu1 %v282_v51  ;;  %286 = vadd.xlane.f32.xlu0 %v285_v54 }
  0xe1   : > { %289 = vadd.xlane.f32.xlu1 %v288_v55 }
 0x15e   : > { %v269_v56 = vpop.xlane.xlu0 %268 }
 0x15f   : > { %v291_v57 = vmul.f32 0.03125, %v269_v56 }
 0x161   : > { %v299_v58 = vadd.f32 1e-06, %v291_v57 }
 0x162   : > { %v272_v59 = vpop.xlane.xlu1 %271  ;;  %v275_v60 = vpop.xlane.xlu0 %274 }
 0x163   : > { %549 = vrsqrt.f32 %v299_v58  ;;  %v292_v61 = vmul.f32 0.03125, %v272_v59  ;;  %v293_v62 = vmul.f32 0.03125, %v275_v60 }
 0x165   : > { %v300_v63 = vadd.f32 1e-06, %v292_v61  ;;  %v301_v0 = vadd.f32 1e-06, %v293_v62 }
 0x166   : > { %v278_v1 = vpop.xlane.xlu1 %277  ;;  %v281_v2 = vpop.xlane.xlu0 %280 }
 0x167   : > { %551 = vrsqrt.f32 %v300_v63  ;;  %v294_v3 = vmul.f32 0.03125, %v278_v1  ;;  %v295_v4 = vmul.f32 0.03125, %v281_v2 }
 0x168   : > { %553 = vrsqrt.f32 %v301_v0 }
 0x169   : > { %v302_v5 = vadd.f32 1e-06, %v294_v3  ;;  %v303_v6 = vadd.f32 1e-06, %v295_v4 }
 0x16a   : > { %v284_v7 = vpop.xlane.xlu1 %283  ;;  %v287_v8 = vpop.xlane.xlu0 %286 }
 0x16b   : > { %555 = vrsqrt.f32 %v302_v5  ;;  %v296_v9 = vmul.f32 0.03125, %v284_v7  ;;  %v297_v10 = vmul.f32 0.03125, %v287_v8 }
 0x16c   : > { %557 = vrsqrt.f32 %v303_v6 }
 0x16d   : > { %v550_v11 = vpop.eup %549  ;;  %v304_v13 = vadd.f32 1e-06, %v296_v9  ;;  %v305_v14 = vadd.f32 1e-06, %v297_v10 }
 0x16e   : > { %v315_v15 = vmul.f32 %v550_v11, %v835_v20  ;;  %v290_v16 = vpop.xlane.xlu1 %289 }
 0x16f   : > { %559 = vrsqrt.f32 %v304_v13  ;;  %v298_v18 = vmul.f32 0.03125, %v290_v16 }
 0x170   : > { %v330_v19 = vmul.f32 %v474_v12, %v315_v15  ;;  %561 = vrsqrt.f32 %v305_v14 }
 0x171   : > { %v552_v22 = vpop.eup %551  ;;  %v306_v23 = vadd.f32 1e-06, %v298_v18 }
 0x172   : > { %v554_v24 = vpop.eup %553  ;;  %v345_v25 = vadd.f32 %v475_v17, %v330_v19  ;;  %v316_v26 = vmul.f32 %v552_v22, %v843_v28 }
 0x173   : > { %v317_v27 = vmul.f32 %v554_v24, %v837_v21  ;;  %563 = vrsqrt.f32 %v306_v23 }
 0x174   : > { %353 = vst.msk [vmem:[%s886_s10] sm:$0xff] %vm217_vm0, %v345_v25  ;;  %v331_v20 = vmul.f32 %v474_v12, %v316_v26 }
 0x175   : > { %v556_v30 = vpop.eup %555  ;;  %v332_v31 = vmul.f32 %v474_v12, %v317_v27 }
 0x176   : > { %v558_v32 = vpop.eup %557  ;;  %v346_v33 = vadd.f32 %v475_v17, %v331_v20  ;;  %v318_v34 = vmul.f32 %v556_v30, %v845_v29 }
 0x177   : > { %v347_v28 = vadd.f32 %v475_v17, %v332_v31  ;;  %v319_v21 = vmul.f32 %v558_v32, %v853_v38 }
 0x178   : > { %354 = vst.msk [vmem:[%s886_s10 + $0x8] sm:$0xff] %vm217_vm0, %v346_v33  ;;  %v333_v35 = vmul.f32 %v474_v12, %v318_v34 }
 0x179   : > { %v560_v36 = vpop.eup %559  ;;  %355 = vst.msk [vmem:[%s886_s10 + $0x10] sm:$0xff] %vm217_vm0, %v347_v28  ;;  %v334_v37 = vmul.f32 %v474_v12, %v319_v21 }
 0x17a   : > { %v562_v40 = vpop.eup %561  ;;  %v348_v41 = vadd.f32 %v475_v17, %v333_v35  ;;  %v320_v42 = vmul.f32 %v560_v36, %v855_v39 }
 0x17b   : > { %v349_v29 = vadd.f32 %v475_v17, %v334_v37  ;;  %v321_v43 = vmul.f32 %v562_v40, %v863_v48 }
 0x17c   : > { %356 = vst.msk [vmem:[%s886_s10 + $0x18] sm:$0xff] %vm217_vm0, %v348_v41  ;;  %v335_v38 = vmul.f32 %v474_v12, %v320_v42 }
 0x17d   : > { %v564_v44 = vpop.eup %563  ;;  %357 = vst.msk [vmem:[%s886_s10 + $0x20] sm:$0xff] %vm217_vm0, %v349_v29  ;;  %v336_v45 = vmul.f32 %v474_v12, %v321_v43 }
 0x17e   : > { %v350_v46 = vadd.f32 %v475_v17, %v335_v38  ;;  %v322_v47 = vmul.f32 %v564_v44, %v865_v49 }
 0x17f   : > { %v351_v50 = vadd.f32 %v475_v17, %v336_v45 }
 0x180   : > { %358 = vst.msk [vmem:[%s886_s10 + $0x28] sm:$0xff] %vm217_vm0, %v350_v46  ;;  %v337_v39 = vmul.f32 %v474_v12, %v322_v47 }
 0x181   : > { %359 = vst.msk [vmem:[%s886_s10 + $0x30] sm:$0xff] %vm217_vm0, %v351_v50 }
 0x182   : > { %v352_v48 = vadd.f32 %v475_v17, %v337_v39 }
 0x184   : > { %360 = vst.msk [vmem:[%s886_s10 + $0x38] sm:$0xff] %vm217_vm0, %v352_v48 }
 0x185   : > { %608 = shalt.err (!%p605_p5)
}
 0x186   : > { %s609_s19 = scalar_lea.hbm %s912_s30, 1024  ;;  %s613_s6 = scalar_lea.hbm %s968_s3, 2048 }
 0x187   : > { %p610_p4 = scmp.ne.s32.totalorder %s912_s30, %s609_s19  ;;  %p614_p12 = scmp.lt.u32.totalorder %s912_s30, %s968_s3 }
 0x188   : > { %p615_p1 = scmp.lt.u32.totalorder %s613_s6, %s609_s19  ;;  %p617_p8 = scmp.lt.u32.totalorder %s609_s19, %s912_s30 }
 0x189   : > { %p611_p7 = pnand %p610_p4, %p976_p9 }
 0x18a   : > { %p616_p3 = por %p615_p1, %p614_p12 }
 0x18b   : > { %p612_p10 = pneg %p611_p7 }
 0x18c   : > { %p618_p11 = por %p617_p8, %p616_p3 }
 0x18e   : > { %p619_p0 = pnand %p618_p11, %p612_p10 }
 0x190   : > { %622 = shalt.err (!%p619_p0)
}
 0x191   : > { %s683_s10 = smov 128   ;;  %s684_s22 = smov 8  }
 0x192   : > { %485 = dma.vmem_to_hbm [thread:$0]  (%p976_p9), %s914_s23, 1024, %s912_s30, %s362_s15, %s683_s10, %s683_s10, %s684_s22  }
 0x193 PF: > { %s392_s28 = sand.u32 1, %s657_s12   ;;  %p977_p6 = scmp.ne.s32.totalorder %s973_s27, 0 }
 0x194   : > { %p978_p13 = scmp.ge.s32.totalorder %s677_s17, 2  ;;  %s393_s29 = scalar_lea.sflag [#allocation4], %s392_s28 }
 0x196   : > { %p492_p2 = pnand %p978_p13, %p977_p6 }
 0x198   : > { %652 = dma.done.wait (!%p492_p2), %s393_s29, 1024  }
 0x199   : > { %654 = vsyncadd (!%p492_p2), %s393_s29, 4294966272  ;;  %s19_s17 = sadd.s32 1, %s677_s17   ;;  %s979_s12 = smov %s661_s13 }
 0x19a   : > { %p16_p5 = scmp.ge.s32.totalorder %s19_s17, 4   ;;  %s980_s13 = smov %s665_s14 }
 0x19b   : > { %s981_s14 = smov %s761_s26  ;;  %s982_s15 = smov %s673_s16 }
 0x19c   : > { %s983_s16 = smov %s985_s20  ;;  %18 = sbr.rel (!%p16_p5) target bundleno = 6 (0x6), region = 77 }
 0x1a3   :  { %398 = vsyncpa [#allocation3], 1 }
 0x1a4   :  { %400 = vsyncpa [#allocation3 + $0x1], 1 }
 0x1a5   :  { %401 = vsyncpa [#allocation4], 1 }
 0x1a6   :  { %403 = vsyncpa [#allocation4 + $0x1], 1 }

</bundles_post_ra>
